<compile_context>
chip_gen: v7x
topology: tpu7x:2x2x1
jax: 0.10.0
libtpu: 0.0.40
codegen_flags: <defaults>
</compile_context>

<pallas_src>
import jax
import jax.numpy as jnp
from jax.experimental import pallas as pl
from jax.experimental.pallas import tpu as pltpu


def _round_up(x, m):
    return ((x + m - 1) // m) * m


def _device_kind():
    try:
        return jax.devices()[0].device_kind.lower()
    except Exception:
        return ""


def _tensorcores_per_chip():
    """2 on v7x (2 TensorCores/chip), 1 on v5e/v6e.  Safe fallback: 1 (never shrink)."""
    return 2 if "v7" in _device_kind() else 1


def _vmem_limit_bytes():
    kind = _device_kind()
    if "v7" in kind:
        return 48 * 1024 * 1024   # 64 MiB physical VMEM: leave Mosaic scratch headroom.
    if kind:
        return 64 * 1024 * 1024   # v5e/v6e: 128 MiB physical; raise v5e's 16 MiB default.
    return 32 * 1024 * 1024       # unknown backend: conservative.


def _pick_row_tile(M, row_tile, n_cores):
    """Row tile: as large as row_tile allows, multiple of 16 (bf16 sublane packing).

    On 2-TC chips, aim for an even grid-step count >= 4 (>= 2 pipelined steps per core).
    On 1-TC chips never split a small M — it only adds per-step overhead.
    """
    tm = min(row_tile, _round_up(M, 16))
    if n_cores <= 1:
        return tm
    steps = pl.cdiv(M, tm)
    target = max(2 * n_cores, steps + (steps % 2))   # even, >= 2 per core
    if steps != target and tm >= 32:
        tm = max(16, _round_up(pl.cdiv(M, target), 16))
    return tm


def _patch_embed_kernel(x_ref, w_ref, b_ref, o_ref):
    # x_ref: (TM, K) bf16 patch rows; w_ref: (K, D) bf16 resident weight;
    # b_ref: (1, D) f32 resident bias; o_ref: (TM, D) out_dtype.
    # One clean (TM,K) x (K,D) MXU matmul with f32 accumulation; bias added in f32.
    acc = jnp.dot(x_ref[...], w_ref[...], preferred_element_type=jnp.float32)
    o_ref[...] = (acc + b_ref[...]).astype(o_ref.dtype)


def pack_patch_embed_weight(weight, compute_dtype=jnp.bfloat16):
    """Conv2d weight (D, C, p, p) -> dense (K, D) with K-order (kh, kw, c).

    Tiny (D x K); precompute once if patch_embed is called repeatedly.
    """
    D, C, p, _ = weight.shape
    return jnp.transpose(weight, (2, 3, 1, 0)).reshape(C * p * p, D).astype(compute_dtype)


def patch_embed(x, weight, bias, patch_size, *, row_tile=512,
                compute_dtype=jnp.bfloat16, out_dtype=None):
    """x: (B, C, H, W) NCHW; weight: (D, C, p, p); bias: (D,).

    Returns (B, n_patches, D) == Conv2d(C, D, p, stride=p)(x).flatten(2).transpose(1, 2),
    computed in bf16 (f32 accumulation).  Output dtype defaults to compute_dtype (bf16).
    """
    B, C, H, W = x.shape
    p = patch_size
    D = weight.shape[0]
    nph, npw = H // p, W // p
    n_patches = nph * npw
    K = C * p * p
    M = B * n_patches
    out_dtype = compute_dtype if out_dtype is None else out_dtype

    # Single fused cast+relayout pass over the activations (bf16 halves the bytes
    # written); K-order (kh, kw, c) matches pack_patch_embed_weight.  See TODO(synk)
    # in the module comment about eliminating this pass for friendlier input layouts.
    patches = x.astype(compute_dtype).reshape(B, C, nph, p, npw, p)
    patches = jnp.transpose(patches, (0, 2, 4, 3, 5, 1)).reshape(M, K)

    w_mat = pack_patch_embed_weight(weight, compute_dtype)   # (K, D) bf16
    b_mat = bias.reshape(1, D).astype(jnp.float32)           # bias stays f32

    tm = _pick_row_tile(M, row_tile, _tensorcores_per_chip())
    grid = (pl.cdiv(M, tm),)

    in_bytes = jnp.dtype(compute_dtype).itemsize
    out_bytes = jnp.dtype(out_dtype).itemsize
    cost = pl.CostEstimate(
        flops=2 * M * K * D,
        transcendentals=0,
        bytes_accessed=(M * K + K * D) * in_bytes + D * 4 + M * D * out_bytes,
    )
    params = pltpu.CompilerParams(
        dimension_semantics=("parallel",),
        vmem_limit_bytes=_vmem_limit_bytes(),
    )

    def _run(single_buffer_resident):
        if single_buffer_resident:
            # Grid-invariant blocks: single buffer (saves K*D*2 + D*4 bytes of VMEM,
            # which is what keeps tm at 512-1024 on v7x's 64 MiB VMEM for large D).
            w_spec = pl.BlockSpec((K, D), lambda i: (0, 0), pipeline_mode=pl.Buffered(1))
            b_spec = pl.BlockSpec((1, D), lambda i: (0, 0), pipeline_mode=pl.Buffered(1))
        else:
            w_spec = pl.BlockSpec((K, D), lambda i: (0, 0))
            b_spec = pl.BlockSpec((1, D), lambda i: (0, 0))
        return pl.pallas_call(
            _patch_embed_kernel,
            out_shape=jax.ShapeDtypeStruct((M, D), out_dtype),
            grid_spec=pltpu.PrefetchScalarGridSpec(
                num_scalar_prefetch=0,
                grid=grid,
                in_specs=[
                    pl.BlockSpec((tm, K), lambda i: (i, 0)),  # row tile of patches
                    w_spec,                                   # resident weight
                    b_spec,                                   # resident bias
                ],
                out_specs=pl.BlockSpec((tm, D), lambda i: (i, 0)),  # lane-dense 2-D slab
            ),
            compiler_params=params,
            cost_estimate=cost,
        )(patches, w_mat, b_mat)

    try:
        out = _run(True)
    except Exception:
        # Fallback for JAX builds where pipeline_mode / Buffered(1) is not supported:
        # identical kernel, default double-buffered resident blocks.
        out = _run(False)

    return out.reshape(B, n_patches, D)


if __name__ == "__main__":
    # Module defaults, kept small: img_size=32, patch_size=4, C=3, embed_dim=192.
    B, C, H, W = 2, 3, 32, 32
    patch_size = 4
    embed_dim = 192

    key = jax.random.PRNGKey(0)
    kx, kw, kb = jax.random.split(key, 3)
    x = jax.random.normal(kx, (B, C, H, W), dtype=jnp.float32)
    weight = jax.random.normal(
        kw, (embed_dim, C, patch_size, patch_size), dtype=jnp.float32) * 0.02
    bias = jax.random.normal(kb, (embed_dim,), dtype=jnp.float32) * 0.02

    out = jax.block_until_ready(patch_embed(x, weight, bias, patch_size))

    n_patches = (H // patch_size) * (W // patch_size)
    assert out.shape == (B, n_patches, embed_dim), out.shape

    # f32 reference (conv-as-matmul with the same flatten order); loose tol for bf16.
    ref_patches = jnp.transpose(
        x.reshape(B, C, H // patch_size, patch_size, W // patch_size, patch_size),
        (0, 2, 4, 3, 5, 1)).reshape(B, n_patches, -1)
    ref_w = jnp.transpose(weight, (2, 3, 1, 0)).reshape(-1, embed_dim)
    ref = ref_patches @ ref_w + bias
    out_f32 = out.astype(jnp.float32)
    max_err = float(jnp.max(jnp.abs(out_f32 - ref)))
    assert jnp.allclose(out_f32, ref, rtol=5e-2, atol=5e-2), max_err

    print("KERNEL_OK")
</pallas_src>

<mosaic_0001>
module attributes {stable_mosaic.version = 11 : i64} {
  func.func @_patch_embed_kernel(%arg0: i32, %arg1: memref<128x48xbf16, #tpu.memory_space<vmem>>, %arg2: memref<48x192xbf16, #tpu.memory_space<vmem>>, %arg3: memref<1x192xf32, #tpu.memory_space<vmem>>, %arg4: memref<128x192xbf16, #tpu.memory_space<vmem>>) attributes {dimension_semantics = [#tpu.dimension_semantics<parallel>], iteration_bounds = array<i64: 1>, scalar_prefetch = 0 : i64, scratch_operands = 0 : i64, tpu.core_type = #tpu.core_type<tc>, window_params = [{transform_indices = @transform_0, window_bounds = array<i64: 128, 48>}, {pipeline_mode = #tpu.pipeline_mode<synchronous>, transform_indices = @transform_1, window_bounds = array<i64: 48, 192>}, {pipeline_mode = #tpu.pipeline_mode<synchronous>, transform_indices = @transform_2, window_bounds = array<i64: 1, 192>}, {transform_indices = @transform_3, window_bounds = array<i64: 128, 192>}]} {
    %c0 = arith.constant 0 : index
    %c0_0 = arith.constant 0 : index
    %0 = vector.load %arg1[%c0, %c0_0] : memref<128x48xbf16, #tpu.memory_space<vmem>>, vector<128x48xbf16>
    %c0_1 = arith.constant 0 : index
    %c0_2 = arith.constant 0 : index
    %1 = vector.load %arg2[%c0_1, %c0_2] : memref<48x192xbf16, #tpu.memory_space<vmem>>, vector<48x192xbf16>
    %cst = arith.constant dense<0.000000e+00> : vector<128x192xf32>
    %2 = tpu.matmul %0, %1, %cst {dimension_numbers = #tpu.dot_dimension_numbers<[1], [0], [0], [1], [0, 0, 1, 1], [], []>} : vector<128x48xbf16>, vector<48x192xbf16>, vector<128x192xf32> -> vector<128x192xf32>
    %c0_3 = arith.constant 0 : index
    %c0_4 = arith.constant 0 : index
    %3 = vector.load %arg3[%c0_3, %c0_4] : memref<1x192xf32, #tpu.memory_space<vmem>>, vector<1x192xf32>
    %4 = vector.broadcast %3 : vector<1x192xf32> to vector<128x192xf32>
    %5 = arith.addf %2, %4 : vector<128x192xf32>
    %6 = arith.truncf %5 : vector<128x192xf32> to vector<128x192xbf16>
    %c0_5 = arith.constant 0 : index
    %c0_6 = arith.constant 0 : index
    %7 = vector.load %arg4[%c0_5, %c0_6] : memref<128x192xbf16, #tpu.memory_space<vmem>>, vector<128x192xbf16>
    tpu.vector_store %arg4[%c0_5, %c0_6], %6 {strides = array<i32>} : memref<128x192xbf16, #tpu.memory_space<vmem>>, vector<128x192xbf16>,
    return
  }
  func.func @transform_0(%arg0: i32) -> (i32, i32) {
    %c0_i32 = arith.constant 0 : i32
    %c0_i32_0 = arith.constant 0 : i32
    return %arg0, %c0_i32 : i32, i32
  }
  func.func @transform_1(%arg0: i32) -> (i32, i32) {
    %c0_i32 = arith.constant 0 : i32
    %c0_i32_0 = arith.constant 0 : i32
    %c0_i32_1 = arith.constant 0 : i32
    return %c0_i32, %c0_i32_0 : i32, i32
  }
  func.func @transform_2(%arg0: i32) -> (i32, i32) {
    %c0_i32 = arith.constant 0 : i32
    %c0_i32_0 = arith.constant 0 : i32
    %c0_i32_1 = arith.constant 0 : i32
    return %c0_i32, %c0_i32_0 : i32, i32
  }
  func.func @transform_3(%arg0: i32) -> (i32, i32) {
    %c0_i32 = arith.constant 0 : i32
    %c0_i32_0 = arith.constant 0 : i32
    return %arg0, %c0_i32 : i32, i32
  }
}

module attributes {stable_mosaic.version = 11 : i64} {
  func.func @_patch_embed_kernel(%arg0: i32, %arg1: memref<128x48xbf16, #tpu.memory_space<vmem>>, %arg2: memref<48x192xbf16, #tpu.memory_space<vmem>>, %arg3: memref<1x192xf32, #tpu.memory_space<vmem>>, %arg4: memref<128x192xbf16, #tpu.memory_space<vmem>>) attributes {dimension_semantics = [#tpu.dimension_semantics<parallel>], iteration_bounds = array<i64: 1>, scalar_prefetch = 0 : i64, scratch_operands = 0 : i64, tpu.core_type = #tpu.core_type<tc>, window_params = [{transform_indices = @transform_0, window_bounds = array<i64: 128, 48>}, {pipeline_mode = #tpu.pipeline_mode<synchronous>, transform_indices = @transform_1, window_bounds = array<i64: 48, 192>}, {pipeline_mode = #tpu.pipeline_mode<synchronous>, transform_indices = @transform_2, window_bounds = array<i64: 1, 192>}, {transform_indices = @transform_3, window_bounds = array<i64: 128, 192>}]} {
    %c0 = arith.constant 0 : index
    %c0_0 = arith.constant 0 : index
    %0 = vector.load %arg1[%c0, %c0_0] : memref<128x48xbf16, #tpu.memory_space<vmem>>, vector<128x48xbf16>
    %c0_1 = arith.constant 0 : index
    %c0_2 = arith.constant 0 : index
    %1 = vector.load %arg2[%c0_1, %c0_2] : memref<48x192xbf16, #tpu.memory_space<vmem>>, vector<48x192xbf16>
    %cst = arith.constant dense<0.000000e+00> : vector<128x192xf32>
    %2 = tpu.matmul %0, %1, %cst {dimension_numbers = #tpu.dot_dimension_numbers<[1], [0], [0], [1], [0, 0, 1, 1], [], []>} : vector<128x48xbf16>, vector<48x192xbf16>, vector<128x192xf32> -> vector<128x192xf32>
    %c0_3 = arith.constant 0 : index
    %c0_4 = arith.constant 0 : index
    %3 = vector.load %arg3[%c0_3, %c0_4] : memref<1x192xf32, #tpu.memory_space<vmem>>, vector<1x192xf32>
    %4 = vector.broadcast %3 : vector<1x192xf32> to vector<128x192xf32>
    %5 = arith.addf %2, %4 : vector<128x192xf32>
    %6 = arith.truncf %5 : vector<128x192xf32> to vector<128x192xbf16>
    %c0_5 = arith.constant 0 : index
    %c0_6 = arith.constant 0 : index
    %7 = vector.load %arg4[%c0_5, %c0_6] : memref<128x192xbf16, #tpu.memory_space<vmem>>, vector<128x192xbf16>
    tpu.vector_store %arg4[%c0_5, %c0_6], %6 {strides = array<i32>} : memref<128x192xbf16, #tpu.memory_space<vmem>>, vector<128x192xbf16>,
    return
  }
  func.func @transform_0(%arg0: i32) -> (i32, i32) {
    %c0_i32 = arith.constant 0 : i32
    %c0_i32_0 = arith.constant 0 : i32
    return %arg0, %c0_i32 : i32, i32
  }
  func.func @transform_1(%arg0: i32) -> (i32, i32) {
    %c0_i32 = arith.constant 0 : i32
    %c0_i32_0 = arith.constant 0 : i32
    %c0_i32_1 = arith.constant 0 : i32
    return %c0_i32, %c0_i32_0 : i32, i32
  }
  func.func @transform_2(%arg0: i32) -> (i32, i32) {
    %c0_i32 = arith.constant 0 : i32
    %c0_i32_0 = arith.constant 0 : i32
    %c0_i32_1 = arith.constant 0 : i32
    return %c0_i32, %c0_i32_0 : i32, i32
  }
  func.func @transform_3(%arg0: i32) -> (i32, i32) {
    %c0_i32 = arith.constant 0 : i32
    %c0_i32_0 = arith.constant 0 : i32
    return %arg0, %c0_i32 : i32, i32
  }
}

</mosaic_0001>

<bundles_post_ra>
// kernel: tpu_custom_call.1
= control target key start
LH: loop header
LB: loop body
LE: loop exit
PB: predicated region body
PF: predicated region fallthrough
CT: control target
= control target key end

     0   :  { %8 = vsyncpa [#allocation3], 0  ;;  %s773_s0 = inlined_call_operand.hbm [shape: bf16[128,48], index: 0, kind: input, shape index: {}]   ;;  %s774_s1 = inlined_call_operand.hbm [shape: bf16[48,192], index: 1, kind: input, shape index: {}]   ;;  %s775_s2 = inlined_call_operand.hbm [shape: f32[1,192], index: 2, kind: input, shape index: {}]   ;;  %s776_s3 = inlined_call_operand.hbm [shape: bf16[128,192], index: 3, kind: output, shape index: {}]  }
   0x1   :  { %9 = vsyncpa [#allocation6], 0 }
   0x2   :  { %10 = vsyncpa [#allocation4], 0  ;;  %s610_s12 = smov [#allocation5]   ;;  %s516_s16 = scalar_lea.hbm %s774_s1, 768 }
   0x3   :  { %s28_s13 = sshll.u32 %s610_s12, 4  ;;  %p517_p0 = scmp.ne.s32.totalorder %s774_s1, %s516_s16  ;;  %s29_s13 = int_to_ptr.vmem [resolvable:$true] %s28_s13 }
   0x4   :  { %p520_p1 = scmp.lt.u32.totalorder %s516_s16, %s774_s1 }
   0x6   :  { %p522_p2 = pnand %p520_p1, %p517_p0 }
   0x8   :  { %525 = shalt.err (!%p522_p2)
}
   0x9   :  { %s526_s21 = scalar_lea.vmem %s29_s13, 768  ;;  %p531_p4 = scmp.lt.s32.totalorder %s29_s13, %s29_s13 }
   0xa   :  { %p527_p3 = scmp.ne.s32.totalorder %s29_s13, %s526_s21  ;;  %p532_p5 = scmp.lt.s32.totalorder %s526_s21, %s526_s21 }
   0xc   :  { %p533_p6 = por %p532_p5, %p531_p4 }
   0xe   :  { %p534_p7 = pnand %p533_p6, %p527_p3 }
  0x10   :  { %537 = shalt.err (!%p534_p7)
}
  0x11   :  { %s611_s22 = smov 128   ;;  %s612_s23 = smov 8  }
  0x12   :  { %34 = dma.hbm_to_vmem [thread:$0]  %s774_s1, 768, %s29_s13, [#allocation6], %s611_s22, %s611_s22, %s612_s23  }
  0x13   :  { %s613_s26 = smov [#allocation2]   ;;  %s538_s30 = scalar_lea.hbm %s773_s0, 1024 }
  0x14   :  { %s16_s27 = sshll.u32 %s613_s26, 4  ;;  %p539_p8 = scmp.ne.s32.totalorder %s773_s0, %s538_s30  ;;  %s17_s27 = int_to_ptr.vmem [resolvable:$true] %s16_s27 }
  0x15   :  { %p542_p9 = scmp.lt.u32.totalorder %s538_s30, %s773_s0 }
  0x17   :  { %p544_p10 = pnand %p542_p9, %p539_p8 }
  0x19   :  { %547 = shalt.err (!%p544_p10)
}
  0x1a   :  { %s548_s8 = scalar_lea.vmem %s17_s27, 1024  ;;  %p553_p12 = scmp.lt.s32.totalorder %s17_s27, %s17_s27 }
  0x1b   :  { %p549_p11 = scmp.ne.s32.totalorder %s17_s27, %s548_s8  ;;  %p554_p13 = scmp.lt.s32.totalorder %s548_s8, %s548_s8 }
  0x1d   :  { %p555_p0 = por %p554_p13, %p553_p12 }
  0x1f   :  { %p556_p1 = pnand %p555_p0, %p549_p11 }
  0x21   :  { %559 = shalt.err (!%p556_p1)
}
  0x22   :  { %s614_s1 = smov 64   ;;  %s615_s9 = smov 4  }
  0x23   :  { %22 = dma.hbm_to_vmem [thread:$0]  %s773_s0, 1024, %s17_s27, [#allocation3], %s614_s1, %s614_s1, %s615_s9  }
  0x24   :  { %s616_s12 = smov [#allocation7]   ;;  %s560_s16 = scalar_lea.hbm %s775_s2, 32 }
  0x25   :  { %s41_s13 = sshll.u32 %s616_s12, 4  ;;  %p561_p2 = scmp.ne.s32.totalorder %s775_s2, %s560_s16  ;;  %s42_s13 = int_to_ptr.vmem [resolvable:$true] %s41_s13 }
  0x26   :  { %p564_p3 = scmp.lt.u32.totalorder %s560_s16, %s775_s2 }
  0x28   :  { %p566_p4 = pnand %p564_p3, %p561_p2 }
  0x2a   :  { %569 = shalt.err (!%p566_p4)
}
  0x2b   :  { %s570_s21 = scalar_lea.vmem %s42_s13, 32  ;;  %p575_p6 = scmp.lt.s32.totalorder %s42_s13, %s42_s13 }
  0x2c   :  { %p571_p5 = scmp.ne.s32.totalorder %s42_s13, %s570_s21  ;;  %p576_p7 = scmp.lt.s32.totalorder %s570_s21, %s570_s21 }
  0x2e   :  { %p577_p8 = por %p576_p7, %p575_p6 }
  0x30   :  { %p578_p9 = pnand %p577_p8, %p571_p5 }
  0x32   :  { %581 = shalt.err (!%p578_p9)
}
  0x33   :  { %44 = dma.hbm_to_vmem [thread:$0]  %s775_s2, 32, %s42_s13, [#allocation6]  }
  0x34   :  { %604 = dma.done.wait [#allocation3], 1024  }
  0x35   :  { %605 = vsyncadd [#allocation3], 4294966272 }
  0x36   :  { %606 = dma.done.wait [#allocation6], 800  }
  0x37   :  { %607 = vsyncadd [#allocation6], 4294966496  ;;  %v617_v0 = vmov 0   ;;  %v499_v1 = vld [vmem:[#allocation5 + $0x4] ss:$8 sps:$4 sm:$0xff]   ;;  %vm159_vm0 = vcmask 392192   ;;  %v79_v15 = vlaneseq }
  0x38   :  { %216 = vmatprep.mubr.bf16.mxu0 %v617_v0  ;;  %256 = vmatprep.mubr.bf16.mxu1 %v617_v0  ;;  %v501_v2 = vld [vmem:[#allocation5] ss:$8 sps:$4 sm:$0xff]   ;;  %v502_v3 = vld [vmem:[#allocation5 + $0x14] ss:$8 sps:$4 sm:$0xff]   ;;  %v504_v4 = vld [vmem:[#allocation5 + $0x10] ss:$8 sps:$4 sm:$0xff]  }
  0x39   :  { %184 = vmatprep.subr.bf16.mxu0 %v499_v1  ;;  %484 = vmatprep.subr.bf16.mxu1 %v499_v1  ;;  %v505_v5 = vld [vmem:[#allocation5 + $0x24] ss:$8 sps:$4 sm:$0xff]   ;;  %v507_v6 = vld [vmem:[#allocation5 + $0x20] ss:$8 sps:$4 sm:$0xff]   ;;  %v512_v11 = vld [vmem:[#allocation2 + $0x10] sm:$0xff]   ;;  %v80_v16 = vshrl.u32 %v79_v15, 7 }
  0x3a   :  { %185 = vmatpush1.bf16.msra.mxu0 %v501_v2  ;;  %487 = vmatpush1.bf16.msra.mxu1 %v501_v2  ;;  %v508_v7 = vld [vmem:[#allocation2] sm:$0xff]   ;;  %v510_v9 = vld [vmem:[#allocation2 + $0x8] sm:$0xff]   ;;  %v513_v12 = vld [vmem:[#allocation2 + $0x30] sm:$0xff]   ;;  %vm393_vm1 = vcmask 1043456   ;;  %vm394_vm2 = vcmask 523268   ;;  %s618_s2 = smov [#allocation8]  }
  0x3b   :  { %186 = vmatprep.subr.bf16.mxu0 %v502_v3  ;;  %485 = vmatprep.subr.bf16.mxu1 %v502_v3  ;;  %v509_v8 = vld [vmem:[#allocation2 + $0x20] sm:$0xff]   ;;  %v511_v10 = vld [vmem:[#allocation2 + $0x28] sm:$0xff]   ;;  %v514_v13 = vld [vmem:[#allocation2 + $0x18] sm:$0xff]   ;;  %v81_v17 = vsub.s32 0, %v80_v16  ;;  %v85_v19 = vsub.s32 1, %v80_v16  ;;  %s417_s25 = sshll.u32 %s618_s2, 4  ;;  %s418_s25 = int_to_ptr.vmem [resolvable:$true] %s417_s25 }
  0x3c   :  { %v515_v14 = vld [vmem:[#allocation2 + $0x38] sm:$0xff]   ;;  %v77_v18 = vld [vmem:[#allocation7] sm:$0x3]  ;;  %vm694_vm3 = vmor %vm394_vm2, %vm393_vm1  ;;  %s582_s26 = scalar_lea.vmem %s418_s25, 2048  ;;  %p587_p11 = scmp.lt.s32.totalorder %s418_s25, %s418_s25 }
  0x3d   :  { %v686_v20 = vrot.slane %v77_v18, %v81_v17  ;;  %v688_v21 = vrot.slane %v77_v18, %v85_v19  ;;  %p583_p10 = scmp.ne.s32.totalorder %s418_s25, %s582_s26  ;;  %p588_p12 = scmp.lt.s32.totalorder %s582_s26, %s582_s26 }
  0x3e   :  { %187 = vmatpush1.bf16.msra.mxu0 %v504_v4  ;;  %488 = vmatpush1.bf16.msra.mxu1 %v504_v4 }
  0x3f   :  { %188 = vmatprep.subr.bf16.mxu0 %v505_v5  ;;  %486 = vmatprep.subr.bf16.mxu1 %v505_v5  ;;  %p589_p13 = por %p588_p12, %p587_p11 }
  0x41   :  { %p590_p0 = pnand %p589_p13, %p583_p10 }
  0x42   :  { %189 = vmatpush1.bf16.msra.mxu0 %v507_v6  ;;  %489 = vmatpush1.bf16.msra.mxu1 %v507_v6 }
  0x45   :  { %444 = vmatmul.mubr.msk.bf16.vlgmr.msra.gmra.mrb[0].mxu0 %vm159_vm0, %v508_v7  ;;  %448 = vmatmul.mubr.msk.bf16.vlgmr.msra.gmra.mrb[0].mxu1 %vm159_vm0, %v509_v8 }
  0x46   :  { %226 = vmatprep.mubr.bf16.mxu0 %v617_v0  ;;  %266 = vmatprep.mubr.bf16.mxu1 %v617_v0 }
  0x4d   :  { %445 = vmatmul.mubr.msk.bf16.gmra.mrb[4].mxu0 %vm159_vm0, %v510_v9  ;;  %449 = vmatmul.mubr.msk.bf16.gmra.mrb[4].mxu1 %vm159_vm0, %v511_v10 }
  0x4e   :  { %236 = vmatprep.mubr.bf16.mxu0 %v617_v0  ;;  %276 = vmatprep.mubr.bf16.mxu1 %v617_v0 }
  0x55   :  { %446 = vmatmul.mubr.msk.bf16.gmra.mrb[8].mxu0 %vm159_vm0, %v512_v11  ;;  %450 = vmatmul.mubr.msk.bf16.gmra.mrb[8].mxu1 %vm159_vm0, %v513_v12 }
  0x56   :  { %246 = vmatprep.mubr.bf16.mxu0 %v617_v0  ;;  %286 = vmatprep.mubr.bf16.mxu1 %v617_v0 }
  0x5d   :  { %447 = vmatmul.mubr.msk.bf16.gmra.mrb[12].mxu0 %vm159_vm0, %v514_v13  ;;  %451 = vmatmul.mubr.msk.bf16.gmra.mrb[12].mxu1 %vm159_vm0, %v515_v14 }
 0x118   :  { %v218_v22 = vpop.f32.mrb[0].mxu0  ;;  %v258_v23 = vpop.f32.mrb[0].mxu1 }
 0x119   :  { %v219_v24 = vadd.f32 %v218_v22, %v686_v20  ;;  %v259_v25 = vadd.f32 %v258_v23, %v686_v20  ;;  %v220_v26 = vpop.f32.mrb[1].mxu0  ;;  %v260_v27 = vpop.f32.mrb[1].mxu1 }
 0x11a   :  { %v221_v28 = vadd.f32 %v220_v26, %v688_v21  ;;  %v261_v29 = vadd.f32 %v260_v27, %v688_v21  ;;  %v222_v30 = vpop.f32.mrb[2].mxu0  ;;  %v262_v31 = vpop.f32.mrb[2].mxu1 }
 0x11b   :  { %v223_v33 = vadd.f32 %v222_v30, %v686_v20  ;;  %v263_v34 = vadd.f32 %v262_v31, %v686_v20  ;;  %v224_v35 = vpop.f32.mrb[3].mxu0  ;;  %v264_v36 = vpop.f32.mrb[3].mxu1 }
 0x11c   :  { %v468_v37 = vpack.c.bf16 %v221_v28, %v219_v24  ;;  %v476_v38 = vpack.c.bf16 %v261_v29, %v259_v25  ;;  %v225_v39 = vadd.f32 %v224_v35, %v688_v21  ;;  %v265_v40 = vadd.f32 %v264_v36, %v688_v21 }
 0x11e   :  { %396 = vst.msk [vmem:[#allocation8] sm:$0xff] %vm694_vm3, %v468_v37  ;;  %404 = vst.msk [vmem:[#allocation8 + $0x40] sm:$0xff] %vm694_vm3, %v476_v38  ;;  %v469_v41 = vpack.c.bf16 %v225_v39, %v223_v33  ;;  %v477_v42 = vpack.c.bf16 %v265_v40, %v263_v34 }
 0x120   :  { %397 = vst.msk [vmem:[#allocation8 + $0x8] sm:$0xff] %vm694_vm3, %v469_v41  ;;  %405 = vst.msk [vmem:[#allocation8 + $0x48] sm:$0xff] %vm694_vm3, %v477_v42  ;;  %v228_v43 = vpop.f32.mrb[4].mxu0  ;;  %v268_v44 = vpop.f32.mrb[4].mxu1 }
 0x121   :  { %v229_v45 = vadd.f32 %v228_v43, %v686_v20  ;;  %v269_v46 = vadd.f32 %v268_v44, %v686_v20  ;;  %v230_v47 = vpop.f32.mrb[5].mxu0  ;;  %v270_v48 = vpop.f32.mrb[5].mxu1 }
 0x122   :  { %v231_v49 = vadd.f32 %v230_v47, %v688_v21  ;;  %v271_v50 = vadd.f32 %v270_v48, %v688_v21  ;;  %v232_v51 = vpop.f32.mrb[6].mxu0  ;;  %v272_v52 = vpop.f32.mrb[6].mxu1 }
 0x123   :  { %v233_v53 = vadd.f32 %v232_v51, %v686_v20  ;;  %v273_v54 = vadd.f32 %v272_v52, %v686_v20  ;;  %v234_v55 = vpop.f32.mrb[7].mxu0  ;;  %v274_v56 = vpop.f32.mrb[7].mxu1 }
 0x124   :  { %v470_v57 = vpack.c.bf16 %v231_v49, %v229_v45  ;;  %v478_v58 = vpack.c.bf16 %v271_v50, %v269_v46  ;;  %v235_v59 = vadd.f32 %v234_v55, %v688_v21  ;;  %v275_v60 = vadd.f32 %v274_v56, %v688_v21 }
 0x126   :  { %398 = vst.msk [vmem:[#allocation8 + $0x10] sm:$0xff] %vm694_vm3, %v470_v57  ;;  %406 = vst.msk [vmem:[#allocation8 + $0x50] sm:$0xff] %vm694_vm3, %v478_v58  ;;  %v471_v61 = vpack.c.bf16 %v235_v59, %v233_v53  ;;  %v479_v62 = vpack.c.bf16 %v275_v60, %v273_v54 }
 0x128   :  { %399 = vst.msk [vmem:[#allocation8 + $0x18] sm:$0xff] %vm694_vm3, %v471_v61  ;;  %407 = vst.msk [vmem:[#allocation8 + $0x58] sm:$0xff] %vm694_vm3, %v479_v62  ;;  %v238_v63 = vpop.f32.mrb[8].mxu0  ;;  %v278_v0 = vpop.f32.mrb[8].mxu1 }
 0x129   :  { %v239_v1 = vadd.f32 %v238_v63, %v686_v20  ;;  %v279_v2 = vadd.f32 %v278_v0, %v686_v20  ;;  %v240_v3 = vpop.f32.mrb[9].mxu0  ;;  %v280_v4 = vpop.f32.mrb[9].mxu1 }
 0x12a   :  { %v241_v5 = vadd.f32 %v240_v3, %v688_v21  ;;  %v281_v6 = vadd.f32 %v280_v4, %v688_v21  ;;  %v242_v7 = vpop.f32.mrb[10].mxu0  ;;  %v282_v8 = vpop.f32.mrb[10].mxu1 }
 0x12b   :  { %v243_v9 = vadd.f32 %v242_v7, %v686_v20  ;;  %v283_v10 = vadd.f32 %v282_v8, %v686_v20  ;;  %v244_v11 = vpop.f32.mrb[11].mxu0  ;;  %v284_v12 = vpop.f32.mrb[11].mxu1 }
 0x12c   :  { %v472_v13 = vpack.c.bf16 %v241_v5, %v239_v1  ;;  %v480_v14 = vpack.c.bf16 %v281_v6, %v279_v2  ;;  %v245_v15 = vadd.f32 %v244_v11, %v688_v21  ;;  %v285_v16 = vadd.f32 %v284_v12, %v688_v21 }
 0x12e   :  { %400 = vst.msk [vmem:[#allocation8 + $0x20] sm:$0xff] %vm694_vm3, %v472_v13  ;;  %408 = vst.msk [vmem:[#allocation8 + $0x60] sm:$0xff] %vm694_vm3, %v480_v14  ;;  %v473_v17 = vpack.c.bf16 %v245_v15, %v243_v9  ;;  %v481_v18 = vpack.c.bf16 %v285_v16, %v283_v10 }
 0x130   :  { %401 = vst.msk [vmem:[#allocation8 + $0x28] sm:$0xff] %vm694_vm3, %v473_v17  ;;  %409 = vst.msk [vmem:[#allocation8 + $0x68] sm:$0xff] %vm694_vm3, %v481_v18  ;;  %v248_v19 = vpop.f32.mrb[12].mxu0  ;;  %v288_v22 = vpop.f32.mrb[12].mxu1 }
 0x131   :  { %v249_v23 = vadd.f32 %v248_v19, %v686_v20  ;;  %v289_v24 = vadd.f32 %v288_v22, %v686_v20  ;;  %v250_v25 = vpop.f32.mrb[13].mxu0  ;;  %v290_v26 = vpop.f32.mrb[13].mxu1 }
 0x132   :  { %v251_v27 = vadd.f32 %v250_v25, %v688_v21  ;;  %v291_v28 = vadd.f32 %v290_v26, %v688_v21  ;;  %v252_v29 = vpop.f32.mrb[14].mxu0  ;;  %v292_v30 = vpop.f32.mrb[14].mxu1 }
 0x133   :  { %v253_v31 = vadd.f32 %v252_v29, %v686_v20  ;;  %v293_v33 = vadd.f32 %v292_v30, %v686_v20  ;;  %v254_v34 = vpop.f32.mrb[15].mxu0  ;;  %v294_v35 = vpop.f32.mrb[15].mxu1 }
 0x134   :  { %v474_v36 = vpack.c.bf16 %v251_v27, %v249_v23  ;;  %v482_v37 = vpack.c.bf16 %v291_v28, %v289_v24  ;;  %v255_v38 = vadd.f32 %v254_v34, %v688_v21  ;;  %v295_v39 = vadd.f32 %v294_v35, %v688_v21 }
 0x136   :  { %402 = vst.msk [vmem:[#allocation8 + $0x30] sm:$0xff] %vm694_vm3, %v474_v36  ;;  %410 = vst.msk [vmem:[#allocation8 + $0x70] sm:$0xff] %vm694_vm3, %v482_v37  ;;  %v475_v40 = vpack.c.bf16 %v255_v38, %v253_v31  ;;  %v483_v41 = vpack.c.bf16 %v295_v39, %v293_v33 }
 0x138   :  { %403 = vst.msk [vmem:[#allocation8 + $0x38] sm:$0xff] %vm694_vm3, %v475_v40  ;;  %411 = vst.msk [vmem:[#allocation8 + $0x78] sm:$0xff] %vm694_vm3, %v483_v41 }
 0x139   :  { %593 = shalt.err (!%p590_p0)
}
 0x13a   :  { %s594_s29 = scalar_lea.hbm %s776_s3, 2048 }
 0x13b   :  { %p595_p1 = scmp.ne.s32.totalorder %s776_s3, %s594_s29  ;;  %p598_p2 = scmp.lt.u32.totalorder %s594_s29, %s776_s3 }
 0x13d   :  { %p600_p3 = pnand %p598_p2, %p595_p1 }
 0x13f   :  { %603 = shalt.err (!%p600_p3)
}
 0x140   :  { %423 = dma.vmem_to_hbm [thread:$0]  %s418_s25, 2048, %s776_s3, [#allocation4], %s611_s22, %s611_s22, %s612_s23  }
 0x141   :  { %608 = dma.done.wait [#allocation4], 2048  }
 0x142   :  { %609 = vsyncadd [#allocation4], 4294965248 }
 0x143   :  { %427 = vsyncpa [#allocation3], 1 }
 0x144   :  { %428 = vsyncpa [#allocation6], 1 }
 0x145   :  { %429 = vsyncpa [#allocation4], 1 }

// kernel: tpu_custom_call.1
= control target key start
LH: loop header
LB: loop body
LE: loop exit
PB: predicated region body
PF: predicated region fallthrough
CT: control target
= control target key end

     0   :  { %8 = vsyncpa [#allocation3], 0  ;;  %s773_s0 = inlined_call_operand.hbm [shape: bf16[128,48], index: 0, kind: input, shape index: {}]   ;;  %s774_s1 = inlined_call_operand.hbm [shape: bf16[48,192], index: 1, kind: input, shape index: {}]   ;;  %s775_s2 = inlined_call_operand.hbm [shape: f32[1,192], index: 2, kind: input, shape index: {}]   ;;  %s776_s3 = inlined_call_operand.hbm [shape: bf16[128,192], index: 3, kind: output, shape index: {}]  }
   0x1   :  { %9 = vsyncpa [#allocation6], 0 }
   0x2   :  { %10 = vsyncpa [#allocation4], 0  ;;  %s610_s12 = smov [#allocation5]   ;;  %s516_s16 = scalar_lea.hbm %s774_s1, 768 }
   0x3   :  { %s28_s13 = sshll.u32 %s610_s12, 4  ;;  %p517_p0 = scmp.ne.s32.totalorder %s774_s1, %s516_s16  ;;  %s29_s13 = int_to_ptr.vmem [resolvable:$true] %s28_s13 }
   0x4   :  { %p520_p1 = scmp.lt.u32.totalorder %s516_s16, %s774_s1 }
   0x6   :  { %p522_p2 = pnand %p520_p1, %p517_p0 }
   0x8   :  { %525 = shalt.err (!%p522_p2)
}
   0x9   :  { %s526_s21 = scalar_lea.vmem %s29_s13, 768  ;;  %p531_p4 = scmp.lt.s32.totalorder %s29_s13, %s29_s13 }
   0xa   :  { %p527_p3 = scmp.ne.s32.totalorder %s29_s13, %s526_s21  ;;  %p532_p5 = scmp.lt.s32.totalorder %s526_s21, %s526_s21 }
   0xc   :  { %p533_p6 = por %p532_p5, %p531_p4 }
   0xe   :  { %p534_p7 = pnand %p533_p6, %p527_p3 }
  0x10   :  { %537 = shalt.err (!%p534_p7)
}
  0x11   :  { %s611_s22 = smov 128   ;;  %s612_s23 = smov 8  }
  0x12   :  { %34 = dma.hbm_to_vmem [thread:$0]  %s774_s1, 768, %s29_s13, [#allocation6], %s611_s22, %s611_s22, %s612_s23  }
  0x13   :  { %s613_s26 = smov [#allocation2]   ;;  %s538_s30 = scalar_lea.hbm %s773_s0, 1024 }
  0x14   :  { %s16_s27 = sshll.u32 %s613_s26, 4  ;;  %p539_p8 = scmp.ne.s32.totalorder %s773_s0, %s538_s30  ;;  %s17_s27 = int_to_ptr.vmem [resolvable:$true] %s16_s27 }
  0x15   :  { %p542_p9 = scmp.lt.u32.totalorder %s538_s30, %s773_s0 }
  0x17   :  { %p544_p10 = pnand %p542_p9, %p539_p8 }
  0x19   :  { %547 = shalt.err (!%p544_p10)
}
  0x1a   :  { %s548_s8 = scalar_lea.vmem %s17_s27, 1024  ;;  %p553_p12 = scmp.lt.s32.totalorder %s17_s27, %s17_s27 }
  0x1b   :  { %p549_p11 = scmp.ne.s32.totalorder %s17_s27, %s548_s8  ;;  %p554_p13 = scmp.lt.s32.totalorder %s548_s8, %s548_s8 }
  0x1d   :  { %p555_p0 = por %p554_p13, %p553_p12 }
  0x1f   :  { %p556_p1 = pnand %p555_p0, %p549_p11 }
  0x21   :  { %559 = shalt.err (!%p556_p1)
}
  0x22   :  { %s614_s1 = smov 64   ;;  %s615_s9 = smov 4  }
  0x23   :  { %22 = dma.hbm_to_vmem [thread:$0]  %s773_s0, 1024, %s17_s27, [#allocation3], %s614_s1, %s614_s1, %s615_s9  }
  0x24   :  { %s616_s12 = smov [#allocation7]   ;;  %s560_s16 = scalar_lea.hbm %s775_s2, 32 }
  0x25   :  { %s41_s13 = sshll.u32 %s616_s12, 4  ;;  %p561_p2 = scmp.ne.s32.totalorder %s775_s2, %s560_s16  ;;  %s42_s13 = int_to_ptr.vmem [resolvable:$true] %s41_s13 }
  0x26   :  { %p564_p3 = scmp.lt.u32.totalorder %s560_s16, %s775_s2 }
  0x28   :  { %p566_p4 = pnand %p564_p3, %p561_p2 }
  0x2a   :  { %569 = shalt.err (!%p566_p4)
}
  0x2b   :  { %s570_s21 = scalar_lea.vmem %s42_s13, 32  ;;  %p575_p6 = scmp.lt.s32.totalorder %s42_s13, %s42_s13 }
  0x2c   :  { %p571_p5 = scmp.ne.s32.totalorder %s42_s13, %s570_s21  ;;  %p576_p7 = scmp.lt.s32.totalorder %s570_s21, %s570_s21 }
  0x2e   :  { %p577_p8 = por %p576_p7, %p575_p6 }
  0x30   :  { %p578_p9 = pnand %p577_p8, %p571_p5 }
  0x32   :  { %581 = shalt.err (!%p578_p9)
}
  0x33   :  { %44 = dma.hbm_to_vmem [thread:$0]  %s775_s2, 32, %s42_s13, [#allocation6]  }
  0x34   :  { %604 = dma.done.wait [#allocation3], 1024  }
  0x35   :  { %605 = vsyncadd [#allocation3], 4294966272 }
  0x36   :  { %606 = dma.done.wait [#allocation6], 800  }
  0x37   :  { %607 = vsyncadd [#allocation6], 4294966496  ;;  %v617_v0 = vmov 0   ;;  %v499_v1 = vld [vmem:[#allocation5 + $0x4] ss:$8 sps:$4 sm:$0xff]   ;;  %vm159_vm0 = vcmask 392192   ;;  %v79_v15 = vlaneseq }
  0x38   :  { %216 = vmatprep.mubr.bf16.mxu0 %v617_v0  ;;  %256 = vmatprep.mubr.bf16.mxu1 %v617_v0  ;;  %v501_v2 = vld [vmem:[#allocation5] ss:$8 sps:$4 sm:$0xff]   ;;  %v502_v3 = vld [vmem:[#allocation5 + $0x14] ss:$8 sps:$4 sm:$0xff]   ;;  %v504_v4 = vld [vmem:[#allocation5 + $0x10] ss:$8 sps:$4 sm:$0xff]  }
  0x39   :  { %184 = vmatprep.subr.bf16.mxu0 %v499_v1  ;;  %484 = vmatprep.subr.bf16.mxu1 %v499_v1  ;;  %v505_v5 = vld [vmem:[#allocation5 + $0x24] ss:$8 sps:$4 sm:$0xff]   ;;  %v507_v6 = vld [vmem:[#allocation5 + $0x20] ss:$8 sps:$4 sm:$0xff]   ;;  %v512_v11 = vld [vmem:[#allocation2 + $0x10] sm:$0xff]   ;;  %v80_v16 = vshrl.u32 %v79_v15, 7 }
  0x3a   :  { %185 = vmatpush1.bf16.msra.mxu0 %v501_v2  ;;  %487 = vmatpush1.bf16.msra.mxu1 %v501_v2  ;;  %v508_v7 = vld [vmem:[#allocation2] sm:$0xff]   ;;  %v510_v9 = vld [vmem:[#allocation2 + $0x8] sm:$0xff]   ;;  %v513_v12 = vld [vmem:[#allocation2 + $0x30] sm:$0xff]   ;;  %vm393_vm1 = vcmask 1043456   ;;  %vm394_vm2 = vcmask 523268   ;;  %s618_s2 = smov [#allocation8]  }
  0x3b   :  { %186 = vmatprep.subr.bf16.mxu0 %v502_v3  ;;  %485 = vmatprep.subr.bf16.mxu1 %v502_v3  ;;  %v509_v8 = vld [vmem:[#allocation2 + $0x20] sm:$0xff]   ;;  %v511_v10 = vld [vmem:[#allocation2 + $0x28] sm:$0xff]   ;;  %v514_v13 = vld [vmem:[#allocation2 + $0x18] sm:$0xff]   ;;  %v81_v17 = vsub.s32 0, %v80_v16  ;;  %v85_v19 = vsub.s32 1, %v80_v16  ;;  %s417_s25 = sshll.u32 %s618_s2, 4  ;;  %s418_s25 = int_to_ptr.vmem [resolvable:$true] %s417_s25 }
  0x3c   :  { %v515_v14 = vld [vmem:[#allocation2 + $0x38] sm:$0xff]   ;;  %v77_v18 = vld [vmem:[#allocation7] sm:$0x3]  ;;  %vm694_vm3 = vmor %vm394_vm2, %vm393_vm1  ;;  %s582_s26 = scalar_lea.vmem %s418_s25, 2048  ;;  %p587_p11 = scmp.lt.s32.totalorder %s418_s25, %s418_s25 }
  0x3d   :  { %v686_v20 = vrot.slane %v77_v18, %v81_v17  ;;  %v688_v21 = vrot.slane %v77_v18, %v85_v19  ;;  %p583_p10 = scmp.ne.s32.totalorder %s418_s25, %s582_s26  ;;  %p588_p12 = scmp.lt.s32.totalorder %s582_s26, %s582_s26 }
  0x3e   :  { %187 = vmatpush1.bf16.msra.mxu0 %v504_v4  ;;  %488 = vmatpush1.bf16.msra.mxu1 %v504_v4 }
  0x3f   :  { %188 = vmatprep.subr.bf16.mxu0 %v505_v5  ;;  %486 = vmatprep.subr.bf16.mxu1 %v505_v5  ;;  %p589_p13 = por %p588_p12, %p587_p11 }
  0x41   :  { %p590_p0 = pnand %p589_p13, %p583_p10 }
  0x42   :  { %189 = vmatpush1.bf16.msra.mxu0 %v507_v6  ;;  %489 = vmatpush1.bf16.msra.mxu1 %v507_v6 }
  0x45   :  { %444 = vmatmul.mubr.msk.bf16.vlgmr.msra.gmra.mrb[0].mxu0 %vm159_vm0, %v508_v7  ;;  %448 = vmatmul.mubr.msk.bf16.vlgmr.msra.gmra.mrb[0].mxu1 %vm159_vm0, %v509_v8 }
  0x46   :  { %226 = vmatprep.mubr.bf16.mxu0 %v617_v0  ;;  %266 = vmatprep.mubr.bf16.mxu1 %v617_v0 }
  0x4d   :  { %445 = vmatmul.mubr.msk.bf16.gmra.mrb[4].mxu0 %vm159_vm0, %v510_v9  ;;  %449 = vmatmul.mubr.msk.bf16.gmra.mrb[4].mxu1 %vm159_vm0, %v511_v10 }
  0x4e   :  { %236 = vmatprep.mubr.bf16.mxu0 %v617_v0  ;;  %276 = vmatprep.mubr.bf16.mxu1 %v617_v0 }
  0x55   :  { %446 = vmatmul.mubr.msk.bf16.gmra.mrb[8].mxu0 %vm159_vm0, %v512_v11  ;;  %450 = vmatmul.mubr.msk.bf16.gmra.mrb[8].mxu1 %vm159_vm0, %v513_v12 }
  0x56   :  { %246 = vmatprep.mubr.bf16.mxu0 %v617_v0  ;;  %286 = vmatprep.mubr.bf16.mxu1 %v617_v0 }
  0x5d   :  { %447 = vmatmul.mubr.msk.bf16.gmra.mrb[12].mxu0 %vm159_vm0, %v514_v13  ;;  %451 = vmatmul.mubr.msk.bf16.gmra.mrb[12].mxu1 %vm159_vm0, %v515_v14 }
 0x118   :  { %v218_v22 = vpop.f32.mrb[0].mxu0  ;;  %v258_v23 = vpop.f32.mrb[0].mxu1 }
 0x119   :  { %v219_v24 = vadd.f32 %v218_v22, %v686_v20  ;;  %v259_v25 = vadd.f32 %v258_v23, %v686_v20  ;;  %v220_v26 = vpop.f32.mrb[1].mxu0  ;;  %v260_v27 = vpop.f32.mrb[1].mxu1 }
 0x11a   :  { %v221_v28 = vadd.f32 %v220_v26, %v688_v21  ;;  %v261_v29 = vadd.f32 %v260_v27, %v688_v21  ;;  %v222_v30 = vpop.f32.mrb[2].mxu0  ;;  %v262_v31 = vpop.f32.mrb[2].mxu1 }
 0x11b   :  { %v223_v33 = vadd.f32 %v222_v30, %v686_v20  ;;  %v263_v34 = vadd.f32 %v262_v31, %v686_v20  ;;  %v224_v35 = vpop.f32.mrb[3].mxu0  ;;  %v264_v36 = vpop.f32.mrb[3].mxu1 }
 0x11c   :  { %v468_v37 = vpack.c.bf16 %v221_v28, %v219_v24  ;;  %v476_v38 = vpack.c.bf16 %v261_v29, %v259_v25  ;;  %v225_v39 = vadd.f32 %v224_v35, %v688_v21  ;;  %v265_v40 = vadd.f32 %v264_v36, %v688_v21 }
 0x11e   :  { %396 = vst.msk [vmem:[#allocation8] sm:$0xff] %vm694_vm3, %v468_v37  ;;  %404 = vst.msk [vmem:[#allocation8 + $0x40] sm:$0xff] %vm694_vm3, %v476_v38  ;;  %v469_v41 = vpack.c.bf16 %v225_v39, %v223_v33  ;;  %v477_v42 = vpack.c.bf16 %v265_v40, %v263_v34 }
 0x120   :  { %397 = vst.msk [vmem:[#allocation8 + $0x8] sm:$0xff] %vm694_vm3, %v469_v41  ;;  %405 = vst.msk [vmem:[#allocation8 + $0x48] sm:$0xff] %vm694_vm3, %v477_v42  ;;  %v228_v43 = vpop.f32.mrb[4].mxu0  ;;  %v268_v44 = vpop.f32.mrb[4].mxu1 }
 0x121   :  { %v229_v45 = vadd.f32 %v228_v43, %v686_v20  ;;  %v269_v46 = vadd.f32 %v268_v44, %v686_v20  ;;  %v230_v47 = vpop.f32.mrb[5].mxu0  ;;  %v270_v48 = vpop.f32.mrb[5].mxu1 }
 0x122   :  { %v231_v49 = vadd.f32 %v230_v47, %v688_v21  ;;  %v271_v50 = vadd.f32 %v270_v48, %v688_v21  ;;  %v232_v51 = vpop.f32.mrb[6].mxu0  ;;  %v272_v52 = vpop.f32.mrb[6].mxu1 }
 0x123   :  { %v233_v53 = vadd.f32 %v232_v51, %v686_v20  ;;  %v273_v54 = vadd.f32 %v272_v52, %v686_v20  ;;  %v234_v55 = vpop.f32.mrb[7].mxu0  ;;  %v274_v56 = vpop.f32.mrb[7].mxu1 }
 0x124   :  { %v470_v57 = vpack.c.bf16 %v231_v49, %v229_v45  ;;  %v478_v58 = vpack.c.bf16 %v271_v50, %v269_v46  ;;  %v235_v59 = vadd.f32 %v234_v55, %v688_v21  ;;  %v275_v60 = vadd.f32 %v274_v56, %v688_v21 }
 0x126   :  { %398 = vst.msk [vmem:[#allocation8 + $0x10] sm:$0xff] %vm694_vm3, %v470_v57  ;;  %406 = vst.msk [vmem:[#allocation8 + $0x50] sm:$0xff] %vm694_vm3, %v478_v58  ;;  %v471_v61 = vpack.c.bf16 %v235_v59, %v233_v53  ;;  %v479_v62 = vpack.c.bf16 %v275_v60, %v273_v54 }
 0x128   :  { %399 = vst.msk [vmem:[#allocation8 + $0x18] sm:$0xff] %vm694_vm3, %v471_v61  ;;  %407 = vst.msk [vmem:[#allocation8 + $0x58] sm:$0xff] %vm694_vm3, %v479_v62  ;;  %v238_v63 = vpop.f32.mrb[8].mxu0  ;;  %v278_v0 = vpop.f32.mrb[8].mxu1 }
 0x129   :  { %v239_v1 = vadd.f32 %v238_v63, %v686_v20  ;;  %v279_v2 = vadd.f32 %v278_v0, %v686_v20  ;;  %v240_v3 = vpop.f32.mrb[9].mxu0  ;;  %v280_v4 = vpop.f32.mrb[9].mxu1 }
 0x12a   :  { %v241_v5 = vadd.f32 %v240_v3, %v688_v21  ;;  %v281_v6 = vadd.f32 %v280_v4, %v688_v21  ;;  %v242_v7 = vpop.f32.mrb[10].mxu0  ;;  %v282_v8 = vpop.f32.mrb[10].mxu1 }
 0x12b   :  { %v243_v9 = vadd.f32 %v242_v7, %v686_v20  ;;  %v283_v10 = vadd.f32 %v282_v8, %v686_v20  ;;  %v244_v11 = vpop.f32.mrb[11].mxu0  ;;  %v284_v12 = vpop.f32.mrb[11].mxu1 }
 0x12c   :  { %v472_v13 = vpack.c.bf16 %v241_v5, %v239_v1  ;;  %v480_v14 = vpack.c.bf16 %v281_v6, %v279_v2  ;;  %v245_v15 = vadd.f32 %v244_v11, %v688_v21  ;;  %v285_v16 = vadd.f32 %v284_v12, %v688_v21 }
 0x12e   :  { %400 = vst.msk [vmem:[#allocation8 + $0x20] sm:$0xff] %vm694_vm3, %v472_v13  ;;  %408 = vst.msk [vmem:[#allocation8 + $0x60] sm:$0xff] %vm694_vm3, %v480_v14  ;;  %v473_v17 = vpack.c.bf16 %v245_v15, %v243_v9  ;;  %v481_v18 = vpack.c.bf16 %v285_v16, %v283_v10 }
 0x130   :  { %401 = vst.msk [vmem:[#allocation8 + $0x28] sm:$0xff] %vm694_vm3, %v473_v17  ;;  %409 = vst.msk [vmem:[#allocation8 + $0x68] sm:$0xff] %vm694_vm3, %v481_v18  ;;  %v248_v19 = vpop.f32.mrb[12].mxu0  ;;  %v288_v22 = vpop.f32.mrb[12].mxu1 }
 0x131   :  { %v249_v23 = vadd.f32 %v248_v19, %v686_v20  ;;  %v289_v24 = vadd.f32 %v288_v22, %v686_v20  ;;  %v250_v25 = vpop.f32.mrb[13].mxu0  ;;  %v290_v26 = vpop.f32.mrb[13].mxu1 }
 0x132   :  { %v251_v27 = vadd.f32 %v250_v25, %v688_v21  ;;  %v291_v28 = vadd.f32 %v290_v26, %v688_v21  ;;  %v252_v29 = vpop.f32.mrb[14].mxu0  ;;  %v292_v30 = vpop.f32.mrb[14].mxu1 }
 0x133   :  { %v253_v31 = vadd.f32 %v252_v29, %v686_v20  ;;  %v293_v33 = vadd.f32 %v292_v30, %v686_v20  ;;  %v254_v34 = vpop.f32.mrb[15].mxu0  ;;  %v294_v35 = vpop.f32.mrb[15].mxu1 }
 0x134   :  { %v474_v36 = vpack.c.bf16 %v251_v27, %v249_v23  ;;  %v482_v37 = vpack.c.bf16 %v291_v28, %v289_v24  ;;  %v255_v38 = vadd.f32 %v254_v34, %v688_v21  ;;  %v295_v39 = vadd.f32 %v294_v35, %v688_v21 }
 0x136   :  { %402 = vst.msk [vmem:[#allocation8 + $0x30] sm:$0xff] %vm694_vm3, %v474_v36  ;;  %410 = vst.msk [vmem:[#allocation8 + $0x70] sm:$0xff] %vm694_vm3, %v482_v37  ;;  %v475_v40 = vpack.c.bf16 %v255_v38, %v253_v31  ;;  %v483_v41 = vpack.c.bf16 %v295_v39, %v293_v33 }
 0x138   :  { %403 = vst.msk [vmem:[#allocation8 + $0x38] sm:$0xff] %vm694_vm3, %v475_v40  ;;  %411 = vst.msk [vmem:[#allocation8 + $0x78] sm:$0xff] %vm694_vm3, %v483_v41 }
 0x139   :  { %593 = shalt.err (!%p590_p0)
}
 0x13a   :  { %s594_s29 = scalar_lea.hbm %s776_s3, 2048 }
 0x13b   :  { %p595_p1 = scmp.ne.s32.totalorder %s776_s3, %s594_s29  ;;  %p598_p2 = scmp.lt.u32.totalorder %s594_s29, %s776_s3 }
 0x13d   :  { %p600_p3 = pnand %p598_p2, %p595_p1 }
 0x13f   :  { %603 = shalt.err (!%p600_p3)
}
 0x140   :  { %423 = dma.vmem_to_hbm [thread:$0]  %s418_s25, 2048, %s776_s3, [#allocation4], %s611_s22, %s611_s22, %s612_s23  }
 0x141   :  { %608 = dma.done.wait [#allocation4], 2048  }
 0x142   :  { %609 = vsyncadd [#allocation4], 4294965248 }
 0x143   :  { %427 = vsyncpa [#allocation3], 1 }
 0x144   :  { %428 = vsyncpa [#allocation6], 1 }
 0x145   :  { %429 = vsyncpa [#allocation4], 1 }

</bundles_post_ra>
